<compile_context>
chip_gen: v6e
topology: v6e:2x2x1
jax: 0.10.0
libtpu: 0.0.40
codegen_flags: <defaults>
</compile_context>

<pallas_src>
import functools

import jax
import jax.numpy as jnp
from jax.experimental import pallas as pl
from jax.experimental.pallas import tpu as pltpu


def mlp_kernel(x_ref, w1_ref, b1_ref, w2_ref, b2_ref, w3_ref, b3_ref, o_ref):
    """Fused 3-layer MLP on one batch tile. All matmuls accumulate in f32."""
    x = x_ref[...]
    # Layer 1: Linear + ReLU.
    h = jnp.dot(x.astype(w1_ref.dtype), w1_ref[...],
                preferred_element_type=jnp.float32)
    h = jnp.maximum(h + b1_ref[...].astype(jnp.float32), 0.0)
    # Layer 2: Linear + ReLU.
    h = jnp.dot(h.astype(w2_ref.dtype), w2_ref[...],
                preferred_element_type=jnp.float32)
    h = jnp.maximum(h + b2_ref[...].astype(jnp.float32), 0.0)
    # Layer 3: Linear (no activation).
    o = jnp.dot(h.astype(w3_ref.dtype), w3_ref[...],
                preferred_element_type=jnp.float32)
    o = o + b3_ref[...].astype(jnp.float32)
    o_ref[...] = o.astype(o_ref.dtype)


def _round_up(n, m):
    return ((n + m - 1) // m) * m


def _lane_padded_bytes(rows, cols, dtype):
    """VMEM footprint of a [rows, cols] operand after (8, 128) tile padding."""
    return _round_up(rows, 8) * _round_up(cols, 128) * jnp.dtype(dtype).itemsize


def _chip_info():
    """(vmem_capacity_bytes, num_tensorcores) with conservative fallbacks."""
    vmem_cap = 64 * 2**20          # conservative: v7x per-TC VMEM
    n_cores = 1
    try:
        info = pltpu.get_tpu_info()
        vmem_cap = int(getattr(info, "vmem_capacity_bytes", vmem_cap))
    except Exception:
        pass
    try:
        kind = jax.devices()[0].device_kind.lower()
        # Megacore chips (2 TensorCores sharing a device): v4, v5p, v7x.
        if any(tag in kind for tag in ("v4", "v5p", "v7", "7x")):
            n_cores = 2
    except Exception:
        pass
    return vmem_cap, n_cores


def _choose_batch_tile(rows, block_b, n_cores):
    """Large batch tile (amortize ~0.35us/grid-step), multiple of 8 sublanes.

    Single-TC chips (v5e/v6e): one tile when the batch fits (splitting only
    adds grid-step + DMA overhead).  Megacore chips (v7x): an even number of
    tiles (>=2) so dimension_semantics=("parallel",) splits work evenly.
    """
    if rows <= 8:
        return rows
    if n_cores <= 1:
        if rows <= block_b:
            return rows
        n_tiles = pl.cdiv(rows, block_b)
    else:
        n_tiles = max(2, pl.cdiv(rows, block_b))
        if n_tiles % 2:
            n_tiles += 1
    tb = _round_up(pl.cdiv(rows, n_tiles), 8)
    return min(tb, rows)


def _block_diag(w, pack):
    """Replicate w `pack` times along the diagonal: [p*in, p*out]."""
    if pack == 1:
        return w
    return jnp.kron(jnp.eye(pack, dtype=w.dtype), w)


@functools.partial(jax.jit, static_argnames=("block_b", "pack"))
def neural_net_mlp(x, params, block_b=1024, pack=8):
    """Forward pass of NeuralNet_MLP.

    x:       [B, in_features]  (features on the lane axis); f32 or bf16.
    params:  dict with w1 [in,hid], b1 [hid], w2 [hid,hid], b2 [hid],
             w3 [hid,out], b3 [out]   (weights transposed vs PyTorch's
             [out,in]).  Weights may be bf16; output dtype follows x.dtype.
    pack:    rows packed per lane-row (block-diagonal replicated weights);
             pack=8 with in=16 gives a dense 128-lane LHS.  pack=1 disables.
    block_b: max packed rows per batch tile.
    """
    w1, b1 = params["w1"], params["b1"]
    w2, b2 = params["w2"], params["b2"]
    w3, b3 = params["w3"], params["b3"]

    B, in_f = x.shape
    hid = w1.shape[1]
    out_f = w3.shape[1]
    out_dtype = x.dtype

    # ---- batch-pack `pack` rows per lane-row (free row-major reshape) ------
    if pack > 1:
        B_pad = _round_up(B, pack)
        if B_pad != B:
            x = jnp.pad(x, ((0, B_pad - B), (0, 0)))
        rows = B_pad // pack
        x_in = x.reshape(rows, pack * in_f)
        # Block-diagonal replicated weights; tiny (<0.5 MiB), built at call
        # time (pre-pack outside jit if calling in a tight loop).
        w1p = _block_diag(w1, pack)
        w2p = _block_diag(w2, pack)
        w3p = _block_diag(w3, pack)
        b1p = jnp.tile(b1, pack)
        b2p = jnp.tile(b2, pack)
        b3p = jnp.tile(b3, pack)
    else:
        B_pad, rows = B, B
        x_in = x
        w1p, w2p, w3p = w1, w2, w3
        b1p, b2p, b3p = b1, b2, b3

    in_p, hid_p, out_p = pack * in_f, pack * hid, pack * out_f

    # Biases as (1, N) so they broadcast over the batch tile inside the kernel.
    b1_2d = b1p.reshape(1, hid_p)
    b2_2d = b2p.reshape(1, hid_p)
    b3_2d = b3p.reshape(1, out_p)

    vmem_cap, n_cores = _chip_info()
    tb = _choose_batch_tile(rows, block_b, n_cores)
    grid = (pl.cdiv(rows, tb),)

    # Explicit VMEM budget: single resident copy of weights/biases, the
    # double-buffered x / out tiles, and the lane-padded (tb, hid_p) f32
    # intermediates, with 2x headroom, capped at HALF the physical VMEM.
    resident = (
        _lane_padded_bytes(in_p, hid_p, w1p.dtype)
        + _lane_padded_bytes(hid_p, hid_p, w2p.dtype)
        + _lane_padded_bytes(hid_p, out_p, w3p.dtype)
        + 2 * _lane_padded_bytes(1, hid_p, b1p.dtype)
        + _lane_padded_bytes(1, out_p, b3p.dtype)
    )
    pipelined = 2 * (_lane_padded_bytes(tb, in_p, x_in.dtype)
                     + _lane_padded_bytes(tb, out_p, out_dtype))
    intermediates = 2 * _lane_padded_bytes(tb, hid_p, jnp.float32)
    vmem_limit = int(min(vmem_cap // 2,
                         max(8 * 2**20,
                             2 * (resident + pipelined + intermediates))))

    out = pl.pallas_call(
        mlp_kernel,
        out_shape=jax.ShapeDtypeStruct((rows, out_p), out_dtype),
        grid_spec=pltpu.PrefetchScalarGridSpec(
            num_scalar_prefetch=0,
            grid=grid,
            in_specs=[
                # Only x is windowed / pipelined over the batch grid.
                pl.BlockSpec((tb, in_p), lambda i: (i, 0)),
                # Grid-invariant weights & biases: whole array resident in
                # VMEM, no per-step DMA, no double buffering.
                pl.BlockSpec(memory_space=pltpu.MemorySpace.VMEM),  # w1
                pl.BlockSpec(memory_space=pltpu.MemorySpace.VMEM),  # b1
                pl.BlockSpec(memory_space=pltpu.MemorySpace.VMEM),  # w2
                pl.BlockSpec(memory_space=pltpu.MemorySpace.VMEM),  # b2
                pl.BlockSpec(memory_space=pltpu.MemorySpace.VMEM),  # w3
                pl.BlockSpec(memory_space=pltpu.MemorySpace.VMEM),  # b3
            ],
            # Last block dim == full array dim -> legal even when < 128 lanes;
            # no output padding, no post-call slice.
            out_specs=pl.BlockSpec((tb, out_p), lambda i: (i, 0)),
        ),
        compiler_params=pltpu.CompilerParams(
            dimension_semantics=("parallel",),
            vmem_limit_bytes=vmem_limit,
        ),
    )(x_in, w1p, b1_2d, w2p, b2_2d, w3p, b3_2d)

    if pack > 1:
        out = out.reshape(B_pad, out_f)   # free row-major reshape
        if B_pad != B:
            out = out[:B]
    return out


def init_params(key, in_features, hidden_features, out_features,
                dtype=jnp.float32):
    """Init mimicking nn.Linear's U(-1/sqrt(fan_in), 1/sqrt(fan_in)).

    Weights are stored transposed ([in, out]) relative to PyTorch's [out, in]
    so the kernel can do x @ W directly.
    """
    ks = jax.random.split(key, 6)

    def linear(kw, kb, fan_in, fan_out):
        bound = 1.0 / jnp.sqrt(fan_in)
        w = jax.random.uniform(kw, (fan_in, fan_out), dtype,
                               minval=-bound, maxval=bound)
        b = jax.random.uniform(kb, (fan_out,), dtype,
                               minval=-bound, maxval=bound)
        return w, b

    w1, b1 = linear(ks[0], ks[1], in_features, hidden_features)
    w2, b2 = linear(ks[2], ks[3], hidden_features, hidden_features)
    w3, b3 = linear(ks[4], ks[5], hidden_features, out_features)
    return dict(w1=w1, b1=b1, w2=w2, b2=b2, w3=w3, b3=b3)


def reference_mlp(x, params):
    h = jnp.maximum(x @ params["w1"] + params["b1"], 0.0)
    h = jnp.maximum(h @ params["w2"] + params["b2"], 0.0)
    return h @ params["w3"] + params["b3"]


if __name__ == "__main__":
    key = jax.random.PRNGKey(0)
    k_x, k_p, k_x2 = jax.random.split(key, 3)

    in_features, hidden_features, out_features = 16, 32, 8
    batch = 64

    x = jax.random.normal(k_x, (batch, in_features), jnp.float32)
    params = init_params(k_p, in_features, hidden_features, out_features)
    ref = reference_mlp(x, params)

    # f32 params, batch-packed path (default): must match the f32 reference.
    out = jax.block_until_ready(neural_net_mlp(x, params))
    assert out.shape == (batch, out_features), out.shape
    assert jnp.allclose(out, ref, atol=1e-4, rtol=1e-4), "packed f32 mismatch"

    # Unpacked path (pack=1) still works and matches.
    out_np = jax.block_until_ready(neural_net_mlp(x, params, pack=1))
    assert out_np.shape == (batch, out_features), out_np.shape
    assert jnp.allclose(out_np, ref, atol=1e-4, rtol=1e-4), "pack=1 mismatch"

    # Ragged batch (not a multiple of the packing factor).
    x_rag = jax.random.normal(k_x2, (37, in_features), jnp.float32)
    out_rag = jax.block_until_ready(neural_net_mlp(x_rag, params))
    ref_rag = reference_mlp(x_rag, params)
    assert out_rag.shape == (37, out_features), out_rag.shape
    assert jnp.allclose(out_rag, ref_rag, atol=1e-4, rtol=1e-4), "ragged mismatch"

    # bf16 weights (recommended on v6e/v7x): cast happens only at the MXU
    # inputs; bias-add / ReLU / accumulation stay f32 inside the kernel.
    params_bf16 = {k: v.astype(jnp.bfloat16) for k, v in params.items()}
    out_bf16 = jax.block_until_ready(neural_net_mlp(x, params_bf16))
    assert out_bf16.shape == (batch, out_features), out_bf16.shape
    assert float(jnp.max(jnp.abs(out_bf16 - ref))) < 0.1, "bf16 weights drifted too far"

    print("KERNEL_OK")
</pallas_src>

<mosaic_0001>
module attributes {stable_mosaic.version = 11 : i64} {
  func.func @mlp_kernel(%arg0: i32, %arg1: memref<8x128xf32, #tpu.memory_space<vmem>>, %arg2: memref<128x256xf32, #tpu.memory_space<vmem>>, %arg3: memref<1x256xf32, #tpu.memory_space<vmem>>, %arg4: memref<256x256xf32, #tpu.memory_space<vmem>>, %arg5: memref<1x256xf32, #tpu.memory_space<vmem>>, %arg6: memref<256x64xf32, #tpu.memory_space<vmem>>, %arg7: memref<1x64xf32, #tpu.memory_space<vmem>>, %arg8: memref<8x64xf32, #tpu.memory_space<vmem>>) attributes {dimension_semantics = [#tpu.dimension_semantics<parallel>], iteration_bounds = array<i64: 1>, scalar_prefetch = 0 : i64, scratch_operands = 0 : i64, tpu.core_type = #tpu.core_type<tc>, window_params = [{transform_indices = @transform_0, window_bounds = array<i64: 8, 128>}, {pipeline_mode = #tpu.pipeline_mode<synchronous>, transform_indices = @transform_1, window_bounds = array<i64: 128, 256>}, {pipeline_mode = #tpu.pipeline_mode<synchronous>, transform_indices = @transform_2, window_bounds = array<i64: 1, 256>}, {pipeline_mode = #tpu.pipeline_mode<synchronous>, transform_indices = @transform_3, window_bounds = array<i64: 256, 256>}, {pipeline_mode = #tpu.pipeline_mode<synchronous>, transform_indices = @transform_4, window_bounds = array<i64: 1, 256>}, {pipeline_mode = #tpu.pipeline_mode<synchronous>, transform_indices = @transform_5, window_bounds = array<i64: 256, 64>}, {pipeline_mode = #tpu.pipeline_mode<synchronous>, transform_indices = @transform_6, window_bounds = array<i64: 1, 64>}, {transform_indices = @transform_7, window_bounds = array<i64: 8, 64>}]} {
    %c0 = arith.constant 0 : index
    %c0_0 = arith.constant 0 : index
    %0 = vector.load %arg1[%c0, %c0_0] : memref<8x128xf32, #tpu.memory_space<vmem>>, vector<8x128xf32>
    %c0_1 = arith.constant 0 : index
    %c0_2 = arith.constant 0 : index
    %1 = vector.load %arg2[%c0_1, %c0_2] : memref<128x256xf32, #tpu.memory_space<vmem>>, vector<128x256xf32>
    %cst = arith.constant dense<0.000000e+00> : vector<8x256xf32>
    %2 = tpu.matmul %0, %1, %cst {dimension_numbers = #tpu.dot_dimension_numbers<[1], [0], [0], [1], [0, 0, 1, 1], [], []>} : vector<8x128xf32>, vector<128x256xf32>, vector<8x256xf32> -> vector<8x256xf32>
    %c0_3 = arith.constant 0 : index
    %c0_4 = arith.constant 0 : index
    %3 = vector.load %arg3[%c0_3, %c0_4] : memref<1x256xf32, #tpu.memory_space<vmem>>, vector<1x256xf32>
    %4 = vector.broadcast %3 : vector<1x256xf32> to vector<8x256xf32>
    %5 = arith.addf %2, %4 : vector<8x256xf32>
    %cst_5 = arith.constant 0.000000e+00 : f32
    %6 = vector.broadcast %cst_5 : f32 to vector<8x256xf32>
    %7 = arith.maximumf %5, %6 : vector<8x256xf32>
    %c0_6 = arith.constant 0 : index
    %c0_7 = arith.constant 0 : index
    %8 = vector.load %arg4[%c0_6, %c0_7] : memref<256x256xf32, #tpu.memory_space<vmem>>, vector<256x256xf32>
    %cst_8 = arith.constant dense<0.000000e+00> : vector<8x256xf32>
    %9 = tpu.matmul %7, %8, %cst_8 {dimension_numbers = #tpu.dot_dimension_numbers<[1], [0], [0], [1], [0, 0, 1, 1], [], []>} : vector<8x256xf32>, vector<256x256xf32>, vector<8x256xf32> -> vector<8x256xf32>
    %c0_9 = arith.constant 0 : index
    %c0_10 = arith.constant 0 : index
    %10 = vector.load %arg5[%c0_9, %c0_10] : memref<1x256xf32, #tpu.memory_space<vmem>>, vector<1x256xf32>
    %11 = vector.broadcast %10 : vector<1x256xf32> to vector<8x256xf32>
    %12 = arith.addf %9, %11 : vector<8x256xf32>
    %cst_11 = arith.constant 0.000000e+00 : f32
    %13 = vector.broadcast %cst_11 : f32 to vector<8x256xf32>
    %14 = arith.maximumf %12, %13 : vector<8x256xf32>
    %c0_12 = arith.constant 0 : index
    %c0_13 = arith.constant 0 : index
    %15 = vector.load %arg6[%c0_12, %c0_13] : memref<256x64xf32, #tpu.memory_space<vmem>>, vector<256x64xf32>
    %cst_14 = arith.constant dense<0.000000e+00> : vector<8x64xf32>
    %16 = tpu.matmul %14, %15, %cst_14 {dimension_numbers = #tpu.dot_dimension_numbers<[1], [0], [0], [1], [0, 0, 1, 1], [], []>} : vector<8x256xf32>, vector<256x64xf32>, vector<8x64xf32> -> vector<8x64xf32>
    %c0_15 = arith.constant 0 : index
    %c0_16 = arith.constant 0 : index
    %17 = vector.load %arg7[%c0_15, %c0_16] : memref<1x64xf32, #tpu.memory_space<vmem>>, vector<1x64xf32>
    %18 = vector.broadcast %17 : vector<1x64xf32> to vector<8x64xf32>
    %19 = arith.addf %16, %18 : vector<8x64xf32>
    %c0_17 = arith.constant 0 : index
    %c0_18 = arith.constant 0 : index
    %20 = vector.load %arg8[%c0_17, %c0_18] : memref<8x64xf32, #tpu.memory_space<vmem>>, vector<8x64xf32>
    tpu.vector_store %arg8[%c0_17, %c0_18], %19 {strides = array<i32>} : memref<8x64xf32, #tpu.memory_space<vmem>>, vector<8x64xf32>,
    return
  }
  func.func @transform_0(%arg0: i32) -> (i32, i32) {
    %c0_i32 = arith.constant 0 : i32
    %c0_i32_0 = arith.constant 0 : i32
    return %arg0, %c0_i32 : i32, i32
  }
  func.func @transform_1(%arg0: i32) -> (i32, i32) {
    %c0_i32 = arith.constant 0 : i32
    %c0_i32_0 = arith.constant 0 : i32
    %c0_i32_1 = arith.constant 0 : i32
    return %c0_i32, %c0_i32_0 : i32, i32
  }
  func.func @transform_2(%arg0: i32) -> (i32, i32) {
    %c0_i32 = arith.constant 0 : i32
    %c0_i32_0 = arith.constant 0 : i32
    %c0_i32_1 = arith.constant 0 : i32
    return %c0_i32, %c0_i32_0 : i32, i32
  }
  func.func @transform_3(%arg0: i32) -> (i32, i32) {
    %c0_i32 = arith.constant 0 : i32
    %c0_i32_0 = arith.constant 0 : i32
    %c0_i32_1 = arith.constant 0 : i32
    return %c0_i32, %c0_i32_0 : i32, i32
  }
  func.func @transform_4(%arg0: i32) -> (i32, i32) {
    %c0_i32 = arith.constant 0 : i32
    %c0_i32_0 = arith.constant 0 : i32
    %c0_i32_1 = arith.constant 0 : i32
    return %c0_i32, %c0_i32_0 : i32, i32
  }
  func.func @transform_5(%arg0: i32) -> (i32, i32) {
    %c0_i32 = arith.constant 0 : i32
    %c0_i32_0 = arith.constant 0 : i32
    %c0_i32_1 = arith.constant 0 : i32
    return %c0_i32, %c0_i32_0 : i32, i32
  }
  func.func @transform_6(%arg0: i32) -> (i32, i32) {
    %c0_i32 = arith.constant 0 : i32
    %c0_i32_0 = arith.constant 0 : i32
    %c0_i32_1 = arith.constant 0 : i32
    return %c0_i32, %c0_i32_0 : i32, i32
  }
  func.func @transform_7(%arg0: i32) -> (i32, i32) {
    %c0_i32 = arith.constant 0 : i32
    %c0_i32_0 = arith.constant 0 : i32
    return %arg0, %c0_i32 : i32, i32
  }
}

</mosaic_0001>

<bundles_post_ra>
// kernel: tile.18
= control target key start
LH: loop header
LB: loop body
LE: loop exit
PB: predicated region body
PF: predicated region fallthrough
CT: control target
= control target key end

     0   :  { %s22_s0 = inlined_call_operand.vmem [shape: f32[32], index: 0, kind: input, shape index: {}]   ;;  %s23_s1 = inlined_call_operand.vmem [shape: f32[8,32], index: 1, kind: output, shape index: {}]  }
   0x1   :  { %v4_v0 = vld [vmem:[%s22_s0] ss:$0 sm:$0xff] }
   0x2   :  { %5 = vst [vmem:[%s23_s1] sm:$0xff] %v4_v0 }

// kernel: tile.27
= control target key start
LH: loop header
LB: loop body
LE: loop exit
PB: predicated region body
PF: predicated region fallthrough
CT: control target
= control target key end

     0   :  { %s7_s6 = smov 3  ;;  %s14_s9 = smov 3  ;;  %vm4_vm0 = vcmask 261120   ;;  %vm11_vm1 = vcmask 1048320   ;;  %vm18_vm2 = vcmask 785920   ;;  %vm25_vm3 = vcmask 523520   ;;  %s79_s0 = inlined_call_operand.vmem [shape: f32[8,32], index: 0, kind: input, shape index: {}]   ;;  %s80_s1 = inlined_call_operand.vmem [shape: f32[1,256], index: 1, kind: output, shape index: {}]  }
   0x1   :  { %v41_v0 = vld [vmem:[%s79_s0 + $0x3] ss:$4 sm:%s7_s6]   ;;  %s48_s10 = smov 96   ;;  %s21_s11 = smov 3  ;;  %v42_v1 = vld [vmem:[%s79_s0 + $0x2] ss:$4 sm:%s14_s9]  }
   0x2   :  { %9 = vrot.lane.b32.xlu0 %v41_v0, %s48_s10  ;;  %v43_v2 = vld [vmem:[%s79_s0 + $0x1] ss:$4 sm:%s21_s11]   ;;  %s2_s16 = smov 3  ;;  %s49_s17 = smov 32  }
   0x3   :  { %23 = vrot.lane.b32.xlu1 %v43_v2, %s49_s17  ;;  %v3_v3 = vld [vmem:[%s79_s0] ss:$4 sm:%s2_s16]   ;;  %s50_s0 = smov 64  }
   0x4   :  { %5 = vst.msk [vmem:[#allocation0] ss:$8 sm:$0x3] %vm4_vm0, %v3_v3  }
   0x6   :  { %16 = vrot.lane.b32.xlu0 %v42_v1, %s50_s0 }
  0x74   :  { %v10_v4 = vpop.permute.xlu0 %9  }
  0x75   :  { %12 = vst.msk [vmem:[#allocation0] ss:$8 sm:$0x3] %vm11_vm1, %v10_v4   ;;  %v24_v5 = vpop.permute.xlu1 %23  }
  0x78   :  { %v17_v6 = vpop.permute.xlu0 %16  }
  0x79   :  { %19 = vst.msk [vmem:[#allocation0] ss:$8 sm:$0x3] %vm18_vm2, %v17_v6  }
  0x7a   :  { %26 = vst.msk [vmem:[#allocation0] ss:$8 sm:$0x3] %vm25_vm3, %v24_v5  }
  0x81   :  { %v31_v7 = vld [vmem:[#allocation0] sm:$0x1]  ;;  %v36_v8 = vld [vmem:[#allocation0 + $0x8] sm:$0x1] }
  0x82   :  { %34 = vst [vmem:[%s80_s1] sm:$0x1] %v31_v7  ;;  %44 = vst [vmem:[%s80_s1 + $0x1] sm:$0x1] %v36_v8 }

// kernel: tile.26
= control target key start
LH: loop header
LB: loop body
LE: loop exit
PB: predicated region body
PF: predicated region fallthrough
CT: control target
= control target key end

     0   :  { %s22_s0 = inlined_call_operand.vmem [shape: f32[8], index: 0, kind: input, shape index: {}]   ;;  %s23_s1 = inlined_call_operand.vmem [shape: f32[8,8], index: 1, kind: output, shape index: {}]  }
   0x1   :  { %v4_v0 = vld [vmem:[%s22_s0] ss:$0 sm:$0xff] }
   0x2   :  { %5 = vst [vmem:[%s23_s1] sm:$0xff] %v4_v0 }

// kernel: tile.29
= control target key start
LH: loop header
LB: loop body
LE: loop exit
PB: predicated region body
PF: predicated region fallthrough
CT: control target
= control target key end

     0   :  { %s69_s10 = smov 56   ;;  %s70_s11 = smov 40   ;;  %vm3_vm0 = vcmask 64512   ;;  %vm9_vm1 = vcmask 523712   ;;  %vm15_vm2 = vcmask 458112   ;;  %vm21_vm3 = vcmask 392512   ;;  %s113_s0 = inlined_call_operand.vmem [shape: f32[8,8], index: 0, kind: input, shape index: {}]   ;;  %s114_s1 = inlined_call_operand.vmem [shape: f32[1,64], index: 1, kind: output, shape index: {}]  }
   0x1   :  { %v55_v0 = vld [vmem:[%s113_s0 + $0x7] sm:$0x1]   ;;  %v57_v1 = vld [vmem:[%s113_s0 + $0x5] sm:$0x1]   ;;  %v56_v2 = vld [vmem:[%s113_s0 + $0x6] sm:$0x1]  }
   0x2   :  { %7 = vrot.lane.b32.xlu0 %v55_v0, %s69_s10  ;;  %19 = vrot.lane.b32.xlu1 %v57_v1, %s70_s11  ;;  %v58_v3 = vld [vmem:[%s113_s0 + $0x4] sm:$0x1]   ;;  %v2_v4 = vld [vmem:[%s113_s0] sm:$0x1]   ;;  %s71_s18 = smov 48   ;;  %s72_s19 = smov 32  }
   0x3   :  { %4 = vst.msk [vmem:[#allocation0] sm:$0x1] %vm3_vm0, %v2_v4   ;;  %v59_v5 = vld [vmem:[%s113_s0 + $0x3] sm:$0x1]   ;;  %v60_v6 = vld [vmem:[%s113_s0 + $0x2] sm:$0x1]  }
   0x4   :  { %s73_s24 = smov 24   ;;  %s74_s25 = smov 16   ;;  %v61_v7 = vld [vmem:[%s113_s0 + $0x1] sm:$0x1]   ;;  %vm27_vm4 = vcmask 326912   ;;  %vm33_vm5 = vcmask 261312  }
   0x5   :  { %s75_s0 = smov 8   ;;  %vm39_vm6 = vcmask 195712   ;;  %vm45_vm7 = vcmask 130112  }
   0x6   :  { %13 = vrot.lane.b32.xlu0 %v56_v2, %s71_s18  ;;  %25 = vrot.lane.b32.xlu1 %v58_v3, %s72_s19 }
   0xa   :  { %31 = vrot.lane.b32.xlu0 %v59_v5, %s73_s24  ;;  %37 = vrot.lane.b32.xlu1 %v60_v6, %s74_s25 }
   0xe   :  { %43 = vrot.lane.b32.xlu0 %v61_v7, %s75_s0 }
  0x74   :  { %v8_v8 = vpop.permute.xlu0 %7   ;;  %v20_v9 = vpop.permute.xlu1 %19  }
  0x75   :  { %10 = vst.msk [vmem:[#allocation0] sm:$0x1] %vm9_vm1, %v8_v8  }
  0x78   :  { %v14_v10 = vpop.permute.xlu0 %13   ;;  %v26_v11 = vpop.permute.xlu1 %25  }
  0x79   :  { %16 = vst.msk [vmem:[#allocation0] sm:$0x1] %vm15_vm2, %v14_v10  }
  0x7a   :  { %22 = vst.msk [vmem:[#allocation0] sm:$0x1] %vm21_vm3, %v20_v9  }
  0x7b   :  { %28 = vst.msk [vmem:[#allocation0] sm:$0x1] %vm27_vm4, %v26_v11  }
  0x7c   :  { %v32_v12 = vpop.permute.xlu0 %31   ;;  %v38_v13 = vpop.permute.xlu1 %37  }
  0x7d   :  { %34 = vst.msk [vmem:[#allocation0] sm:$0x1] %vm33_vm5, %v32_v12  }
  0x7e   :  { %40 = vst.msk [vmem:[#allocation0] sm:$0x1] %vm39_vm6, %v38_v13  }
  0x80   :  { %v44_v14 = vpop.permute.xlu0 %43  }
  0x81   :  { %46 = vst.msk [vmem:[#allocation0] sm:$0x1] %vm45_vm7, %v44_v14  }
  0x88   :  { %v51_v15 = vld [vmem:[#allocation0] sm:$0x1] }
  0x89   :  { %54 = vst [vmem:[%s114_s1] sm:$0x1] %v51_v15 }

// kernel: neural_net_mlp.1
= control target key start
LH: loop header
LB: loop body
LE: loop exit
PB: predicated region body
PF: predicated region fallthrough
CT: control target
= control target key end

     0   :  { %v445_v3 = vmov 0.0   ;;  %vm402_vm0 = vcmask 523264   ;;  %s885_s1 = inlined_call_operand.vmem [shape: f32[128,256], index: 1, kind: input, shape index: {}]   ;;  %s886_s3 = inlined_call_operand.vmem [shape: f32[256,256], index: 3, kind: input, shape index: {}]   ;;  %s887_s0 = inlined_call_operand.vmem [shape: f32[8,128], index: 0, kind: input, shape index: {}]   ;;  %s888_s5 = inlined_call_operand.vmem [shape: f32[256,64], index: 5, kind: input, shape index: {}]   ;;  %s889_s2 = inlined_call_operand.vmem [shape: f32[1,256], index: 2, kind: input, shape index: {}]   ;;  %s890_s4 = inlined_call_operand.vmem [shape: f32[1,256], index: 4, kind: input, shape index: {}]   ;;  %s891_s6 = inlined_call_operand.vmem [shape: f32[1,64], index: 6, kind: input, shape index: {}]   ;;  %s892_s7 = inlined_call_operand.vmem [shape: f32[8,64], index: 7, kind: output, shape index: {}]  }
   0x1   :  { %v58_v0 = vld [vmem:[%s885_s1 + $0xf8] sm:$0xff]  ;;  %v57_v1 = vld [vmem:[%s885_s1 + $0xf0] sm:$0xff]  ;;  %v56_v2 = vld [vmem:[%s885_s1 + $0xe8] sm:$0xff]  ;;  %135 = vmatprep.mubr.f32.mxu0 %v445_v3 }
   0x2   :  { %71 = vmatprep.subr.mxu0 %v58_v0  ;;  %v55_v4 = vld [vmem:[%s885_s1 + $0xe0] sm:$0xff]  ;;  %v54_v5 = vld [vmem:[%s885_s1 + $0xd8] sm:$0xff]  ;;  %v53_v6 = vld [vmem:[%s885_s1 + $0xd0] sm:$0xff] }
   0x3   :  { %72 = vmatpush1.msra.mxu0 %v57_v1  ;;  %v52_v7 = vld [vmem:[%s885_s1 + $0xc8] sm:$0xff]  ;;  %v51_v8 = vld [vmem:[%s885_s1 + $0xc0] sm:$0xff]  ;;  %v50_v9 = vld [vmem:[%s885_s1 + $0xb8] sm:$0xff] }
   0x4   :  { %73 = vmatprep.subr.mxu0 %v56_v2  ;;  %v49_v10 = vld [vmem:[%s885_s1 + $0xb0] sm:$0xff]  ;;  %v48_v11 = vld [vmem:[%s885_s1 + $0xa8] sm:$0xff]  ;;  %v47_v12 = vld [vmem:[%s885_s1 + $0xa0] sm:$0xff] }
   0x5   :  { %74 = vmatpush1.msra.mxu0 %v55_v4  ;;  %v46_v13 = vld [vmem:[%s885_s1 + $0x98] sm:$0xff]  ;;  %v45_v14 = vld [vmem:[%s885_s1 + $0x90] sm:$0xff]  ;;  %v173_v17 = vld [vmem:[%s886_s3 + $0xe8] sm:$0xff] }
   0x6   :  { %75 = vmatprep.subr.mxu0 %v54_v5  ;;  %v175_v15 = vld [vmem:[%s886_s3 + $0xf8] sm:$0xff]  ;;  %v174_v16 = vld [vmem:[%s886_s3 + $0xf0] sm:$0xff]  ;;  %v44_v18 = vld [vmem:[%s885_s1 + $0x88] sm:$0xff] }
   0x7   :  { %76 = vmatpush1.msra.mxu0 %v53_v6  ;;  %220 = vmatprep.subr.mxu1 %v175_v15  ;;  %v172_v19 = vld [vmem:[%s886_s3 + $0xe0] sm:$0xff]  ;;  %v171_v21 = vld [vmem:[%s886_s3 + $0xd8] sm:$0xff]  ;;  %v170_v23 = vld [vmem:[%s886_s3 + $0xd0] sm:$0xff] }
   0x8   :  { %77 = vmatprep.subr.mxu0 %v52_v7  ;;  %v43_v20 = vld [vmem:[%s885_s1 + $0x80] sm:$0xff]  ;;  %221 = vmatpush1.msra.mxu1 %v174_v16  ;;  %v42_v22 = vld [vmem:[%s885_s1 + $0x78] sm:$0xff]  ;;  %v41_v24 = vld [vmem:[%s885_s1 + $0x70] sm:$0xff] }
   0x9   :  { %78 = vmatpush1.msra.mxu0 %v51_v8  ;;  %222 = vmatprep.subr.mxu1 %v173_v17  ;;  %v169_v25 = vld [vmem:[%s886_s3 + $0xc8] sm:$0xff]  ;;  %v168_v27 = vld [vmem:[%s886_s3 + $0xc0] sm:$0xff]  ;;  %v167_v29 = vld [vmem:[%s886_s3 + $0xb8] sm:$0xff] }
   0xa   :  { %79 = vmatprep.subr.mxu0 %v50_v9  ;;  %223 = vmatpush1.msra.mxu1 %v172_v19  ;;  %v40_v26 = vld [vmem:[%s885_s1 + $0x68] sm:$0xff]  ;;  %v39_v28 = vld [vmem:[%s885_s1 + $0x60] sm:$0xff]  ;;  %v38_v30 = vld [vmem:[%s885_s1 + $0x58] sm:$0xff] }
   0xb   :  { %80 = vmatpush1.msra.mxu0 %v49_v10  ;;  %224 = vmatprep.subr.mxu1 %v171_v21  ;;  %v166_v31 = vld [vmem:[%s886_s3 + $0xb0] sm:$0xff]  ;;  %v165_v33 = vld [vmem:[%s886_s3 + $0xa8] sm:$0xff]  ;;  %v164_v35 = vld [vmem:[%s886_s3 + $0xa0] sm:$0xff] }
   0xc   :  { %81 = vmatprep.subr.mxu0 %v48_v11  ;;  %225 = vmatpush1.msra.mxu1 %v170_v23  ;;  %v37_v32 = vld [vmem:[%s885_s1 + $0x50] sm:$0xff]  ;;  %v36_v34 = vld [vmem:[%s885_s1 + $0x48] sm:$0xff]  ;;  %v35_v36 = vld [vmem:[%s885_s1 + $0x40] sm:$0xff] }
   0xd   :  { %82 = vmatpush1.msra.mxu0 %v47_v12  ;;  %226 = vmatprep.subr.mxu1 %v169_v25  ;;  %v163_v37 = vld [vmem:[%s886_s3 + $0x98] sm:$0xff]  ;;  %v162_v39 = vld [vmem:[%s886_s3 + $0x90] sm:$0xff]  ;;  %v161_v41 = vld [vmem:[%s886_s3 + $0x88] sm:$0xff] }
   0xe   :  { %83 = vmatprep.subr.mxu0 %v46_v13  ;;  %227 = vmatpush1.msra.mxu1 %v168_v27  ;;  %v34_v38 = vld [vmem:[%s885_s1 + $0x38] sm:$0xff]  ;;  %v33_v40 = vld [vmem:[%s885_s1 + $0x30] sm:$0xff]  ;;  %v32_v42 = vld [vmem:[%s885_s1 + $0x28] sm:$0xff] }
   0xf   :  { %84 = vmatpush1.msra.mxu0 %v45_v14  ;;  %228 = vmatprep.subr.mxu1 %v167_v29  ;;  %v160_v43 = vld [vmem:[%s886_s3 + $0x80] sm:$0xff]  ;;  %v159_v45 = vld [vmem:[%s886_s3 + $0x78] sm:$0xff]  ;;  %v158_v47 = vld [vmem:[%s886_s3 + $0x70] sm:$0xff] }
  0x10   :  { %85 = vmatprep.subr.mxu0 %v44_v18  ;;  %229 = vmatpush1.msra.mxu1 %v166_v31  ;;  %v31_v44 = vld [vmem:[%s885_s1 + $0x20] sm:$0xff]  ;;  %v30_v46 = vld [vmem:[%s885_s1 + $0x18] sm:$0xff]  ;;  %v29_v48 = vld [vmem:[%s885_s1 + $0x10] sm:$0xff] }
  0x11   :  { %86 = vmatpush1.msra.mxu0 %v43_v20  ;;  %230 = vmatprep.subr.mxu1 %v165_v33  ;;  %v157_v49 = vld [vmem:[%s886_s3 + $0x68] sm:$0xff]  ;;  %v156_v51 = vld [vmem:[%s886_s3 + $0x60] sm:$0xff]  ;;  %v155_v53 = vld [vmem:[%s886_s3 + $0x58] sm:$0xff] }
  0x12   :  { %87 = vmatprep.subr.mxu0 %v42_v22  ;;  %231 = vmatpush1.msra.mxu1 %v164_v35  ;;  %v28_v50 = vld [vmem:[%s885_s1 + $0x8] sm:$0xff]  ;;  %v27_v52 = vld [vmem:[%s885_s1] sm:$0xff]  ;;  %v154_v55 = vld [vmem:[%s886_s3 + $0x50] sm:$0xff] }
  0x13   :  { %88 = vmatpush1.msra.mxu0 %v41_v24  ;;  %232 = vmatprep.subr.mxu1 %v163_v37  ;;  %v26_v54 = vld [vmem:[%s887_s0] sm:$0xff]  ;;  %v153_v56 = vld [vmem:[%s886_s3 + $0x48] sm:$0xff]  ;;  %v151_v58 = vld [vmem:[%s886_s3 + $0x38] sm:$0xff] }
  0x14   :  { %89 = vmatprep.subr.mxu0 %v40_v26  ;;  %233 = vmatpush1.msra.mxu1 %v162_v39  ;;  %v152_v57 = vld [vmem:[%s886_s3 + $0x40] sm:$0xff]  ;;  %v150_v59 = vld [vmem:[%s886_s3 + $0x30] sm:$0xff]  ;;  %v149_v60 = vld [vmem:[%s886_s3 + $0x28] sm:$0xff] }
  0x15   :  { %90 = vmatpush1.msra.mxu0 %v39_v28  ;;  %234 = vmatprep.subr.mxu1 %v161_v41  ;;  %v148_v61 = vld [vmem:[%s886_s3 + $0x20] sm:$0xff]  ;;  %v147_v62 = vld [vmem:[%s886_s3 + $0x18] sm:$0xff]  ;;  %v146_v63 = vld [vmem:[%s886_s3 + $0x10] sm:$0xff] }
  0x16   :  { %91 = vmatprep.subr.mxu0 %v38_v30  ;;  %235 = vmatpush1.msra.mxu1 %v160_v43  ;;  %v145_v0 = vld [vmem:[%s886_s3 + $0x8] sm:$0xff]  ;;  %v144_v1 = vld [vmem:[%s886_s3] sm:$0xff]  ;;  %v207_v2 = vld [vmem:[%s886_s3 + $0x1f8] sm:$0xff] }
  0x17   :  { %92 = vmatpush1.msra.mxu0 %v37_v32  ;;  %236 = vmatprep.subr.mxu1 %v159_v45  ;;  %v206_v3 = vld [vmem:[%s886_s3 + $0x1f0] sm:$0xff]  ;;  %v205_v4 = vld [vmem:[%s886_s3 + $0x1e8] sm:$0xff]  ;;  %v204_v5 = vld [vmem:[%s886_s3 + $0x1e0] sm:$0xff] }
  0x18   :  { %93 = vmatprep.subr.mxu0 %v36_v34  ;;  %237 = vmatpush1.msra.mxu1 %v158_v47  ;;  %v203_v6 = vld [vmem:[%s886_s3 + $0x1d8] sm:$0xff]  ;;  %v202_v7 = vld [vmem:[%s886_s3 + $0x1d0] sm:$0xff]  ;;  %v201_v8 = vld [vmem:[%s886_s3 + $0x1c8] sm:$0xff] }
  0x19   :  { %94 = vmatpush1.msra.mxu0 %v35_v36  ;;  %238 = vmatprep.subr.mxu1 %v157_v49  ;;  %v200_v9 = vld [vmem:[%s886_s3 + $0x1c0] sm:$0xff]  ;;  %v199_v10 = vld [vmem:[%s886_s3 + $0x1b8] sm:$0xff]  ;;  %v198_v11 = vld [vmem:[%s886_s3 + $0x1b0] sm:$0xff] }
  0x1a   :  { %95 = vmatprep.subr.mxu0 %v34_v38  ;;  %239 = vmatpush1.msra.mxu1 %v156_v51  ;;  %v197_v12 = vld [vmem:[%s886_s3 + $0x1a8] sm:$0xff]  ;;  %v196_v13 = vld [vmem:[%s886_s3 + $0x1a0] sm:$0xff]  ;;  %v195_v14 = vld [vmem:[%s886_s3 + $0x198] sm:$0xff] }
  0x1b   :  { %96 = vmatpush1.msra.mxu0 %v33_v40  ;;  %240 = vmatprep.subr.mxu1 %v155_v53  ;;  %v194_v15 = vld [vmem:[%s886_s3 + $0x190] sm:$0xff]  ;;  %v193_v16 = vld [vmem:[%s886_s3 + $0x188] sm:$0xff]  ;;  %v192_v17 = vld [vmem:[%s886_s3 + $0x180] sm:$0xff] }
  0x1c   :  { %97 = vmatprep.subr.mxu0 %v32_v42  ;;  %241 = vmatpush1.msra.mxu1 %v154_v55  ;;  %v191_v18 = vld [vmem:[%s886_s3 + $0x178] sm:$0xff]  ;;  %v190_v19 = vld [vmem:[%s886_s3 + $0x170] sm:$0xff]  ;;  %v189_v20 = vld [vmem:[%s886_s3 + $0x168] sm:$0xff] }
  0x1d   :  { %98 = vmatpush1.msra.mxu0 %v31_v44  ;;  %242 = vmatprep.subr.mxu1 %v153_v56  ;;  %v188_v21 = vld [vmem:[%s886_s3 + $0x160] sm:$0xff]  ;;  %v187_v22 = vld [vmem:[%s886_s3 + $0x158] sm:$0xff]  ;;  %v186_v23 = vld [vmem:[%s886_s3 + $0x150] sm:$0xff] }
  0x1e   :  { %99 = vmatprep.subr.mxu0 %v30_v46  ;;  %243 = vmatpush1.msra.mxu1 %v152_v57  ;;  %v185_v24 = vld [vmem:[%s886_s3 + $0x148] sm:$0xff]  ;;  %v184_v25 = vld [vmem:[%s886_s3 + $0x140] sm:$0xff]  ;;  %v183_v26 = vld [vmem:[%s886_s3 + $0x138] sm:$0xff] }
  0x1f   :  { %100 = vmatpush1.msra.mxu0 %v29_v48  ;;  %244 = vmatprep.subr.mxu1 %v151_v58  ;;  %v182_v27 = vld [vmem:[%s886_s3 + $0x130] sm:$0xff]  ;;  %v181_v28 = vld [vmem:[%s886_s3 + $0x128] sm:$0xff]  ;;  %v180_v29 = vld [vmem:[%s886_s3 + $0x120] sm:$0xff]  ;;  %v61_v58 = vlaneseq }
  0x20   :  { %101 = vmatprep.subr.mxu0 %v28_v50  ;;  %245 = vmatpush1.msra.mxu1 %v150_v59  ;;  %v179_v30 = vld [vmem:[%s886_s3 + $0x118] sm:$0xff]  ;;  %v178_v31 = vld [vmem:[%s886_s3 + $0x110] sm:$0xff]  ;;  %v177_v32 = vld [vmem:[%s886_s3 + $0x108] sm:$0xff] }
  0x21   :  { %102 = vmatpush1.msra.mxu0 %v27_v52  ;;  %246 = vmatprep.subr.mxu1 %v149_v60  ;;  %v176_v33 = vld [vmem:[%s886_s3 + $0x100] sm:$0xff]  ;;  %v324_v34 = vld [vmem:[%s888_s5 + $0xf8] sm:$0xff]  ;;  %v323_v36 = vld [vmem:[%s888_s5 + $0xf0] sm:$0xff]  ;;  %v62_v59 = vshrl.u32 %v61_v58, 7 }
  0x22   :  { %136 = vmatmul.mubr.f32.vlgmr.msra.gmra.mxu0 %v26_v54  ;;  %247 = vmatpush1.msra.mxu1 %v148_v61  ;;  %v308_v35 = vld [vmem:[%s888_s5 + $0x78] sm:$0xff]  ;;  %v307_v37 = vld [vmem:[%s888_s5 + $0x70] sm:$0xff]  ;;  %v322_v38 = vld [vmem:[%s888_s5 + $0xe8] sm:$0xff] }
  0x23   :  { %248 = vmatprep.subr.mxu1 %v147_v62  ;;  %409 = vmatprep.subr.mxu0 %v324_v34  ;;  %v306_v39 = vld [vmem:[%s888_s5 + $0x68] sm:$0xff]  ;;  %v321_v40 = vld [vmem:[%s888_s5 + $0xe0] sm:$0xff]  ;;  %v320_v42 = vld [vmem:[%s888_s5 + $0xd8] sm:$0xff]  ;;  %v63_v60 = vsub.s32 0, %v62_v59  ;;  %v67_v62 = vsub.s32 1, %v62_v59 }
  0x24   :  { %249 = vmatpush1.msra.mxu1 %v146_v63  ;;  %410 = vmatpush3.msra.mxu0 %v308_v35  ;;  %v305_v41 = vld [vmem:[%s888_s5 + $0x60] sm:$0xff]  ;;  %v304_v43 = vld [vmem:[%s888_s5 + $0x58] sm:$0xff]  ;;  %v319_v44 = vld [vmem:[%s888_s5 + $0xd0] sm:$0xff] }
  0x25   :  { %250 = vmatprep.subr.mxu1 %v145_v0  ;;  %411 = vmatprep.subr.mxu0 %v323_v36  ;;  %v303_v45 = vld [vmem:[%s888_s5 + $0x50] sm:$0xff]  ;;  %v318_v46 = vld [vmem:[%s888_s5 + $0xc8] sm:$0xff]  ;;  %v317_v48 = vld [vmem:[%s888_s5 + $0xc0] sm:$0xff] }
  0x26   :  { %251 = vmatpush1.msra.mxu1 %v144_v1  ;;  %412 = vmatpush3.msra.mxu0 %v307_v37  ;;  %v302_v47 = vld [vmem:[%s888_s5 + $0x48] sm:$0xff]  ;;  %v301_v49 = vld [vmem:[%s888_s5 + $0x40] sm:$0xff]  ;;  %v316_v50 = vld [vmem:[%s888_s5 + $0xb8] sm:$0xff] }
  0x27   :  { %252 = vmatprep.subr.mxu1 %v207_v2  ;;  %413 = vmatprep.subr.mxu0 %v322_v38  ;;  %v300_v51 = vld [vmem:[%s888_s5 + $0x38] sm:$0xff]  ;;  %v315_v52 = vld [vmem:[%s888_s5 + $0xb0] sm:$0xff]  ;;  %v314_v54 = vld [vmem:[%s888_s5 + $0xa8] sm:$0xff] }
  0x28   :  { %253 = vmatpush2.msra.mxu1 %v206_v3  ;;  %414 = vmatpush3.msra.mxu0 %v306_v39  ;;  %v299_v53 = vld [vmem:[%s888_s5 + $0x30] sm:$0xff]  ;;  %v298_v55 = vld [vmem:[%s888_s5 + $0x28] sm:$0xff]  ;;  %v313_v56 = vld [vmem:[%s888_s5 + $0xa0] sm:$0xff] }
  0x29   :  { %254 = vmatprep.subr.mxu1 %v205_v4  ;;  %415 = vmatprep.subr.mxu0 %v321_v40  ;;  %v297_v57 = vld [vmem:[%s888_s5 + $0x20] sm:$0xff] }
  0x2a   :  { %255 = vmatpush2.msra.mxu1 %v204_v5  ;;  %416 = vmatpush3.msra.mxu0 %v305_v41  ;;  %v59_v61 = vld [vmem:[%s889_s2] sm:$0x3] }
  0x2b   :  { %256 = vmatprep.subr.mxu1 %v203_v6  ;;  %417 = vmatprep.subr.mxu0 %v320_v42  ;;  %v64_v63 = vrot.slane %v59_v61, %v63_v60  ;;  %v68_v0 = vrot.slane %v59_v61, %v67_v62 }
  0x2c   :  { %257 = vmatpush2.msra.mxu1 %v202_v7  ;;  %418 = vmatpush3.msra.mxu0 %v304_v43  ;;  %v312_v7 = vld [vmem:[%s888_s5 + $0x98] sm:$0xff] }
  0x2d   :  { %258 = vmatprep.subr.mxu1 %v201_v8  ;;  %419 = vmatprep.subr.mxu0 %v319_v44  ;;  %v296_v8 = vld [vmem:[%s888_s5 + $0x18] sm:$0xff] }
  0x2e   :  { %259 = vmatpush2.msra.mxu1 %v200_v9  ;;  %420 = vmatpush3.msra.mxu0 %v303_v45  ;;  %v311_v9 = vld [vmem:[%s888_s5 + $0x90] sm:$0xff] }
  0x2f   :  { %260 = vmatprep.subr.mxu1 %v199_v10  ;;  %421 = vmatprep.subr.mxu0 %v318_v46  ;;  %v295_v10 = vld [vmem:[%s888_s5 + $0x10] sm:$0xff] }
  0x30   :  { %261 = vmatpush2.msra.mxu1 %v198_v11  ;;  %422 = vmatpush3.msra.mxu0 %v302_v47  ;;  %v310_v11 = vld [vmem:[%s888_s5 + $0x88] sm:$0xff] }
  0x31   :  { %262 = vmatprep.subr.mxu1 %v197_v12  ;;  %423 = vmatprep.subr.mxu0 %v317_v48  ;;  %v294_v12 = vld [vmem:[%s888_s5 + $0x8] sm:$0xff] }
  0x32   :  { %263 = vmatpush2.msra.mxu1 %v196_v13  ;;  %424 = vmatpush3.msra.mxu0 %v301_v49  ;;  %v309_v13 = vld [vmem:[%s888_s5 + $0x80] sm:$0xff] }
  0x33   :  { %264 = vmatprep.subr.mxu1 %v195_v14  ;;  %425 = vmatprep.subr.mxu0 %v316_v50  ;;  %v293_v14 = vld [vmem:[%s888_s5] sm:$0xff] }
  0x34   :  { %265 = vmatpush2.msra.mxu1 %v194_v15  ;;  %426 = vmatpush3.msra.mxu0 %v300_v51  ;;  %v208_v15 = vld [vmem:[%s890_s4] sm:$0x3] }
  0x35   :  { %266 = vmatprep.subr.mxu1 %v193_v16  ;;  %427 = vmatprep.subr.mxu0 %v315_v52  ;;  %v213_v16 = vrot.slane %v208_v15, %v63_v60 }
  0x36   :  { %267 = vmatpush2.msra.mxu1 %v192_v17  ;;  %428 = vmatpush3.msra.mxu0 %v299_v53  ;;  %v217_v17 = vrot.slane %v208_v15, %v67_v62 }
  0x37   :  { %268 = vmatprep.subr.mxu1 %v191_v18  ;;  %429 = vmatprep.subr.mxu0 %v314_v54 }
  0x38   :  { %269 = vmatpush2.msra.mxu1 %v190_v19  ;;  %430 = vmatpush3.msra.mxu0 %v298_v55 }
  0x39   :  { %270 = vmatprep.subr.mxu1 %v189_v20  ;;  %431 = vmatprep.subr.mxu0 %v313_v56 }
  0x3a   :  { %271 = vmatpush2.msra.mxu1 %v188_v21  ;;  %432 = vmatpush3.msra.mxu0 %v297_v57 }
  0x3b   :  { %272 = vmatprep.subr.mxu1 %v187_v22  ;;  %433 = vmatprep.subr.mxu0 %v312_v7 }
  0x3c   :  { %273 = vmatpush2.msra.mxu1 %v186_v23  ;;  %434 = vmatpush3.msra.mxu0 %v296_v8 }
  0x3d   :  { %274 = vmatprep.subr.mxu1 %v185_v24  ;;  %435 = vmatprep.subr.mxu0 %v311_v9 }
  0x3e   :  { %275 = vmatpush2.msra.mxu1 %v184_v25  ;;  %436 = vmatpush3.msra.mxu0 %v295_v10  ;;  %v408_v25 = vld [vmem:[%s891_s6] ss:$0 sm:$0xff] }
  0x3f   :  { %276 = vmatprep.subr.mxu1 %v183_v26  ;;  %437 = vmatprep.subr.mxu0 %v310_v11 }
  0x40   :  { %277 = vmatpush2.msra.mxu1 %v182_v27  ;;  %438 = vmatpush3.msra.mxu0 %v294_v12 }
  0x41   :  { %278 = vmatprep.subr.mxu1 %v181_v28  ;;  %439 = vmatprep.subr.mxu0 %v309_v13 }
  0x42   :  { %279 = vmatpush2.msra.mxu1 %v180_v29  ;;  %440 = vmatpush3.msra.mxu0 %v293_v14 }
  0x43   :  { %280 = vmatprep.subr.mxu1 %v179_v30 }
  0x44   :  { %281 = vmatpush2.msra.mxu1 %v178_v31 }
  0x45   :  { %282 = vmatprep.subr.mxu1 %v177_v32 }
  0x46   :  { %283 = vmatpush2.msra.mxu1 %v176_v33 }
  0xe2   :  { %v137_v1 = vpop.f32.mrf.mxu0 }
  0xe3   :  { %v138_v2 = vadd.f32 %v137_v1, %v64_v63 }
  0xe4   :  { %v139_v3 = vpop.f32.mrf.mxu0 }
  0xe5   :  { %v140_v4 = vadd.f32 %v139_v3, %v68_v0  ;;  %v142_v6 = vmax.f32 %v138_v2, 0.0 }
  0xe7   :  { %v143_v5 = vmax.f32 %v140_v4, 0.0 }
  0xe9   :  { %284 = vmatprep.mubr.f32.mxu1 %v143_v5 }
  0xea   :  { %285 = vmatmul.mubr.f32.vlgmr.msra.gmra.mxu1 %v142_v6 }
 0x1aa   :  { %v286_v18 = vpop.f32.mrf.mxu1 }
 0x1ab   :  { %v287_v19 = vadd.f32 %v286_v18, %v213_v16 }
 0x1ac   :  { %v288_v20 = vpop.f32.mrf.mxu1 }
 0x1ad   :  { %v289_v21 = vadd.f32 %v288_v20, %v217_v17  ;;  %v291_v23 = vmax.f32 %v287_v19, 0.0 }
 0x1af   :  { %v292_v22 = vmax.f32 %v289_v21, 0.0 }
 0x1b1   :  { %396 = vmatprep.mubr.f32.mxu0 %v292_v22 }
 0x1b2   :  { %397 = vmatmul.mubr.f32.vlgmr.msra.gmra.mxu0 %v291_v23 }
 0x272   :  { %v441_v24 = vpop.f32.mrf.mxu0 }
 0x274   :  { %v442_v26 = vpop.f32.mrf.mxu0 }
 0x275   :  { %v443_v27 = vadd.f32 %v442_v26, %v441_v24 }
 0x277   :  { %v399_v28 = vadd.f32 %v443_v27, %v408_v25 }
 0x279   :  { %403 = vst.msk [vmem:[%s892_s7] sm:$0xff] %vm402_vm0, %v399_v28 }

</bundles_post_ra>
